<compile_context>
chip_gen: v5e
topology: v5e:2x2
jax: 0.10.0
libtpu: 0.0.40
codegen_flags: <defaults>
</compile_context>

<pallas_src>
import functools
import math

import jax
import jax.numpy as jnp
from jax.experimental import pallas as pl
from jax.experimental.pallas import tpu as pltpu

VMEM = pltpu.MemorySpace.VMEM
SMEM = pltpu.MemorySpace.SMEM


# ---------------------------------------------------------------------------
# VMEM budget / tiling helpers
# ---------------------------------------------------------------------------
def _vmem_budget_bytes():
    """~3/4 of physical VMEM (48 MiB on v7x, capped at 96 MiB on v5e/v6e)."""
    cap = 64 * 1024 * 1024
    try:
        info = pltpu.get_tpu_info()
        cap = int(getattr(info, "vmem_capacity_bytes", cap))
    except Exception:
        pass
    return max(32 * 1024 * 1024, min(cap * 3 // 4, 96 * 1024 * 1024))


def _estimate_vmem_bytes(L, N, D, tq):
    """Rough resident-keys footprint: double-buffered input/output blocks +
    in-kernel (tq, N) f32 temporaries."""
    bf16, f32 = 2, 4
    inputs = (L * tq * D + L * D * N + tq * D + D * N) * bf16
    out = 8 * 128 * f32
    dma = 2 * (inputs + out)        # pipeline double-buffering
    temps = 6 * tq * N * f32        # p_t / zt / zs / products etc.
    return dma + temps


def _pick_row_tile(n, fits):
    """Largest candidate row tile that divides n and fits the VMEM budget."""
    cands = [t for t in (512, 256, 128, 64, 32, 16, 8) if n % t == 0]
    if n <= 512 and n not in cands:
        cands.insert(0, n)
    if not cands:
        cands = [n]                 # TODO(synk): pad N to a tileable size for odd token counts
    for t in cands:
        if fits(t):
            return t
    return cands[-1]


# ---------------------------------------------------------------------------
# Fused kernel: relation softmax + KLDivLoss reduction (relations never hit HBM)
#
#   loss = sum_{l in sel} mean_{b,n} sum_m p_t[b,n,m] * (log p_t - log p_s_l)[b,n,m]
#   where p_x = softmax(A_x @ B_x^T * scale, axis=-1)
#
# Grid: (B, N//TQ).  All selected student layers are VMEM-resident and the
# layer loop runs in-kernel.  Output: per-(b,q) lane-dense (8,128) partial.
# ---------------------------------------------------------------------------
def _fused_relation_kl_kernel(a_s_ref, b_s_ref, a_t_ref, b_t_ref, out_ref,
                              *, num_layers, scale, inv_rows):
    # (tq, D) x (D, N) -> (tq, N) on the MXU; keys are pre-transposed so no
    # per-step XLU transpose is needed.
    dn = (((1,), (0,)), ((), ()))

    # ---- teacher: computed once per (b, q) grid point ----
    st = jax.lax.dot_general(a_t_ref[0], b_t_ref[0], dn,
                             preferred_element_type=jnp.float32) * scale
    zt = st - jnp.max(st, axis=-1, keepdims=True)
    et = jnp.exp(zt)
    se_t = jnp.sum(et, axis=-1, keepdims=True)
    p_t = et / se_t                                    # teacher probabilities
    lse_t = jnp.log(se_t)
    # sum_{rows,m} p_t * log p_t  (rows of p_t sum to 1)
    const = jnp.sum(p_t * zt) - jnp.sum(lse_t)

    # ---- student layers: in-kernel loop, scalar accumulation ----
    def layer_step(l, acc):
        ss = jax.lax.dot_general(a_s_ref[l, 0], b_s_ref[l, 0], dn,
                                 preferred_element_type=jnp.float32) * scale
        zs = ss - jnp.max(ss, axis=-1, keepdims=True)
        lse_s = jnp.log(jnp.sum(jnp.exp(zs), axis=-1, keepdims=True))
        # sum_{rows,m} p_t * log p_s = sum(p_t*zs) - sum(lse_s); no log-softmax
        # of the student is ever materialized.
        cross = jnp.sum(p_t * zs) - jnp.sum(lse_s)
        return acc + (const - cross)

    total = jax.lax.fori_loop(0, num_layers, layer_step, jnp.float32(0.0),
                              unroll=True)

    # Single lane-dense write per grid point (value replicated across the tile).
    out_ref[...] = jnp.full(out_ref.shape, total * inv_rows, jnp.float32)


def fused_relation_kd_loss(a_list, b_list, feat_loc, scale):
    """kd_loss of the SimiKD module, fully fused (relation matrices never hit HBM)."""
    sel = [i for i in range(len(a_list) - 1) if i in feat_loc]
    if not sel:
        return jnp.zeros((), jnp.float32)

    same = a_list is b_list                       # VV relation: dedup stack/cast
    a_s = jnp.stack([a_list[i] for i in sel], axis=0).astype(jnp.bfloat16)   # (L,B,N,D)
    b_src = a_s if same else jnp.stack([b_list[i] for i in sel],
                                       axis=0).astype(jnp.bfloat16)
    b_s = jnp.swapaxes(b_src, -1, -2)                                        # (L,B,D,N)

    a_t = a_list[-1].astype(jnp.bfloat16)                                    # (B,N,D)
    b_t_src = a_t if same else b_list[-1].astype(jnp.bfloat16)
    b_t = jnp.swapaxes(b_t_src, -1, -2)                                      # (B,D,N)

    L, B, N, D = a_s.shape
    budget = _vmem_budget_bytes()
    tq = _pick_row_tile(N, lambda t: _estimate_vmem_bytes(L, N, D, t) <= budget)
    nq = N // tq

    out = pl.pallas_call(
        functools.partial(_fused_relation_kl_kernel,
                          num_layers=L, scale=float(scale),
                          inv_rows=1.0 / float(B * N)),
        out_shape=jax.ShapeDtypeStruct((B, nq, 8, 128), jnp.float32),
        grid_spec=pltpu.PrefetchScalarGridSpec(
            num_scalar_prefetch=0,
            grid=(B, nq),
            in_specs=[
                # student queries, all layers, resident per (b, q-tile)
                pl.BlockSpec((L, 1, tq, D), lambda b, q: (0, b, q, 0)),
                # student keys (pre-transposed), all layers, resident per b
                pl.BlockSpec((L, 1, D, N), lambda b, q: (0, b, 0, 0)),
                # teacher queries / keys
                pl.BlockSpec((1, tq, D), lambda b, q: (b, q, 0)),
                pl.BlockSpec((1, D, N), lambda b, q: (b, 0, 0)),
            ],
            out_specs=pl.BlockSpec((1, 1, 8, 128), lambda b, q: (b, q, 0, 0)),
        ),
        compiler_params=pltpu.CompilerParams(
            dimension_semantics=("parallel", "parallel"),
            vmem_limit_bytes=budget,
        ),
    )(a_s, b_s, a_t, b_t)
    return jnp.sum(out[:, :, 0, 0])


# ---------------------------------------------------------------------------
# Head losses: CrossEntropy(outputs, labels) and DeiT soft/hard KD, fused into
# one pallas_call.  one_hot / argmax are built in-kernel with broadcasted_iota.
# ---------------------------------------------------------------------------
def _head_losses_kernel(logits_ref, labels_ref, deit_s_ref, deit_t_ref, o_ref,
                        *, mode, tau):
    def lse(v):
        m = jnp.max(v, axis=-1, keepdims=True)
        return jnp.log(jnp.sum(jnp.exp(v - m), axis=-1, keepdims=True)) + m

    x = logits_ref[...].astype(jnp.float32)                    # (B, C)
    B, C = x.shape
    cls_iota = jax.lax.broadcasted_iota(jnp.int32, (B, C), 1)
    lbl_mask = (cls_iota == labels_ref[...]).astype(jnp.float32)   # labels (B,1) int32
    # TODO(synk): criterion assumed to be CrossEntropyLoss (ctor-injected in PyTorch).
    o_ref[0, 0] = jnp.sum(lse(x) - jnp.sum(x * lbl_mask, axis=-1, keepdims=True)) / B

    if mode == "none":
        o_ref[0, 1] = jnp.float32(0.0)
        return

    s = deit_s_ref[...].astype(jnp.float32)
    t = deit_t_ref[...].astype(jnp.float32)
    if mode == "soft":
        def log_softmax(v):
            m = jnp.max(v, axis=-1, keepdims=True)
            z = v - m
            return z - jnp.log(jnp.sum(jnp.exp(z), axis=-1, keepdims=True))
        lq_s = log_softmax(s / tau)
        lq_t = log_softmax(t / tau)
        kl = jnp.exp(lq_t) * (lq_t - lq_s)          # kl_div(..., log_target=True)
        o_ref[0, 1] = jnp.sum(kl) * (tau * tau) / (B * C)
    else:  # "hard": CE(student, argmax(teacher)) with first-max tie-break
        mx = jnp.max(t, axis=-1, keepdims=True)
        masked_iota = jnp.where(t == mx, cls_iota, C)
        amax = jnp.min(masked_iota, axis=-1, keepdims=True)
        pick = (cls_iota == amax).astype(jnp.float32)
        o_ref[0, 1] = jnp.sum(lse(s) - jnp.sum(s * pick, axis=-1, keepdims=True)) / B


def head_losses(outputs, labels_i32, deit_logits, deit_target_logits, mode, tau):
    out = pl.pallas_call(
        functools.partial(_head_losses_kernel, mode=mode, tau=float(tau)),
        out_shape=jax.ShapeDtypeStruct((1, 2), jnp.float32),
        in_specs=[pl.BlockSpec(memory_space=VMEM)] * 4,
        out_specs=pl.BlockSpec(memory_space=SMEM),
    )(outputs, labels_i32, deit_logits, deit_target_logits)
    return out[0, 0], out[0, 1]


# ---------------------------------------------------------------------------
# Synthetic student model (glue): patchify + linear embed, per-block Q/K/V.
# The last block plays the role of the "teacher" branch (relation[-1]).
# ---------------------------------------------------------------------------
def init_params(key, *, chans, patch, hidden, num_classes, num_student_layers):
    patch_dim = chans * patch * patch
    keys = jax.random.split(key, 4 + 3 * (num_student_layers + 1))
    params = {
        "patch": patch,
        "hidden": hidden,
        "w_embed": jax.random.normal(keys[0], (patch_dim, hidden), jnp.float32) * 0.05,
        "w_cls": jax.random.normal(keys[1], (hidden, num_classes), jnp.float32) * 0.05,
        "w_deit": jax.random.normal(keys[2], (hidden, num_classes), jnp.float32) * 0.05,
        "layers": [],
    }
    for l in range(num_student_layers + 1):
        kq, kk, kv = keys[3 + 3 * l: 6 + 3 * l]
        params["layers"].append({
            "wq": jax.random.normal(kq, (hidden, hidden), jnp.float32) * 0.05,
            "wk": jax.random.normal(kk, (hidden, hidden), jnp.float32) * 0.05,
            "wv": jax.random.normal(kv, (hidden, hidden), jnp.float32) * 0.05,
        })
    return params


def student_forward(x, params):
    B, C, H, W = x.shape
    p = params["patch"]
    # NCHW -> (B, N, C*p*p) patch tokens
    xt = (x.reshape(B, C, H // p, p, W // p, p)
            .transpose(0, 2, 4, 1, 3, 5)
            .reshape(B, (H // p) * (W // p), C * p * p))
    tokens = jnp.dot(xt, params["w_embed"])                  # (B, N, hidden)

    q_list, k_list, v_list = [], [], []
    for lw in params["layers"]:
        q_list.append(jnp.einsum("bnd,de->bne", tokens, lw["wq"]))
        k_list.append(jnp.einsum("bnd,de->bne", tokens, lw["wk"]))
        v_list.append(jnp.einsum("bnd,de->bne", tokens, lw["wv"]))

    pooled = jnp.mean(tokens, axis=1)                        # (B, hidden)
    outputs = jnp.dot(pooled, params["w_cls"])               # (B, num_classes)
    stu_deit_logits = jnp.dot(pooled, params["w_deit"])      # (B, num_classes)
    return outputs, stu_deit_logits, q_list, k_list, v_list


# ---------------------------------------------------------------------------
# SimiKD.forward
# ---------------------------------------------------------------------------
def simikd_forward(inputs, labels, outputs_t, params, cfg):
    outputs, stu_deit_logits, q_list, k_list, v_list = student_forward(inputs, params)

    mode = cfg["deit_loss_type"]
    if mode not in ("none", "soft", "hard"):
        raise NotImplementedError(mode)

    labels_i32 = labels.astype(jnp.int32).reshape(-1, 1)
    loss_base, loss_deit = head_losses(outputs, labels_i32, stu_deit_logits,
                                       outputs_t, mode, cfg.get("deit_tau", 1.0))

    if mode == "none":
        return loss_base

    scale = 1.0 / math.sqrt(params["hidden"])
    loss_qk = fused_relation_kd_loss(q_list, k_list, cfg["feat_loc"], scale)
    loss_vv = fused_relation_kd_loss(v_list, v_list, cfg["feat_loc"], scale)

    return loss_deit, loss_base, loss_qk, loss_vv, outputs


if __name__ == "__main__":
    key = jax.random.PRNGKey(0)
    k_x, k_lbl, k_t, k_par = jax.random.split(key, 4)

    B, C, H, W = 2, 4, 16, 16
    patch, hidden, num_classes, num_student_layers = 4, 32, 10, 2

    cfg = {"deit_loss_type": "soft", "deit_tau": 1.0, "feat_loc": (0, 1)}

    x = jax.random.normal(k_x, (B, C, H, W), jnp.float32)         # NCHW like PyTorch
    labels = jax.random.randint(k_lbl, (B,), 0, num_classes)
    outputs_t = jax.random.normal(k_t, (B, num_classes), jnp.float32)
    params = init_params(k_par, chans=C, patch=patch, hidden=hidden,
                         num_classes=num_classes,
                         num_student_layers=num_student_layers)

    loss_deit, loss_base, loss_qk, loss_vv, outputs = simikd_forward(
        x, labels, outputs_t, params, cfg)
    jax.block_until_ready((loss_deit, loss_base, loss_qk, loss_vv, outputs))

    print("KERNEL_OK")
</pallas_src>

<mosaic_0001>
module attributes {stable_mosaic.version = 11 : i64} {
  func.func @_head_losses_kernel(%arg0: memref<2x10xf32, #tpu.memory_space<vmem>>, %arg1: memref<2x1xi32, #tpu.memory_space<vmem>>, %arg2: memref<2x10xf32, #tpu.memory_space<vmem>>, %arg3: memref<2x10xf32, #tpu.memory_space<vmem>>, %arg4: memref<1x2xf32, #tpu.memory_space<smem>>) attributes {dimension_semantics = [], scalar_prefetch = 0 : i64, scratch_operands = 0 : i64, tpu.core_type = #tpu.core_type<tc>} {
    %c0 = arith.constant 0 : index
    %c0_0 = arith.constant 0 : index
    %0 = vector.load %arg0[%c0, %c0_0] : memref<2x10xf32, #tpu.memory_space<vmem>>, vector<2x10xf32>
    %1 = tpu.iota {dimensions = array<i32: 1>} : vector<2x10xi32>
    %c0_1 = arith.constant 0 : index
    %c0_2 = arith.constant 0 : index
    %2 = vector.load %arg1[%c0_1, %c0_2] : memref<2x1xi32, #tpu.memory_space<vmem>>, vector<2x1xi32>
    %3 = vector.broadcast %2 : vector<2x1xi32> to vector<2x10xi32>
    %4 = arith.cmpi eq, %1, %3 : vector<2x10xi32>
    %5 = arith.extui %4 : vector<2x10xi1> to vector<2x10xi32>
    %6 = arith.sitofp %5 : vector<2x10xi32> to vector<2x10xf32>
    %cst = arith.constant dense<0xFF800000> : vector<2xf32>
    %7 = vector.multi_reduction <maximumf>, %0, %cst [1] : vector<2x10xf32> to vector<2xf32>
    %8 = vector.shape_cast %7 : vector<2xf32> to vector<2x1xf32>
    %9 = vector.broadcast %8 : vector<2x1xf32> to vector<2x10xf32>
    %10 = arith.subf %0, %9 : vector<2x10xf32>
    %11 = math.exp %10 : vector<2x10xf32>
    %cst_3 = arith.constant dense<0.000000e+00> : vector<2xf32>
    %12 = vector.multi_reduction <add>, %11, %cst_3 [1] : vector<2x10xf32> to vector<2xf32>
    %13 = vector.shape_cast %12 : vector<2xf32> to vector<2x1xf32>
    %14 = math.log %13 : vector<2x1xf32>
    %15 = arith.addf %14, %8 : vector<2x1xf32>
    %16 = arith.mulf %0, %6 : vector<2x10xf32>
    %cst_4 = arith.constant dense<0.000000e+00> : vector<2xf32>
    %17 = vector.multi_reduction <add>, %16, %cst_4 [1] : vector<2x10xf32> to vector<2xf32>
    %18 = vector.shape_cast %17 : vector<2xf32> to vector<2x1xf32>
    %19 = arith.subf %15, %18 : vector<2x1xf32>
    %20 = vector.shape_cast %19 : vector<2x1xf32> to vector<1x2x1xf32>
    %cst_5 = arith.constant dense<0.000000e+00> : vector<1xf32>
    %21 = vector.multi_reduction <add>, %20, %cst_5 [1, 2] : vector<1x2x1xf32> to vector<1xf32>
    %22 = vector.shape_cast %21 : vector<1xf32> to vector<1x1x1xf32>
    %23 = vector.extract %22[0, 0, 0] : f32 from vector<1x1x1xf32>
    %cst_6 = arith.constant 2.000000e+00 : f32
    %24 = arith.divf %23, %cst_6 : f32
    %c0_7 = arith.constant 0 : index
    %c0_8 = arith.constant 0 : index
    %25 = memref.load %arg4[%c0_7, %c0_8] : memref<1x2xf32, #tpu.memory_space<smem>>
    memref.store %24, %arg4[%c0_7, %c0_8] : memref<1x2xf32, #tpu.memory_space<smem>>
    %c0_9 = arith.constant 0 : index
    %c0_10 = arith.constant 0 : index
    %26 = vector.load %arg2[%c0_9, %c0_10] : memref<2x10xf32, #tpu.memory_space<vmem>>, vector<2x10xf32>
    %c0_11 = arith.constant 0 : index
    %c0_12 = arith.constant 0 : index
    %27 = vector.load %arg3[%c0_11, %c0_12] : memref<2x10xf32, #tpu.memory_space<vmem>>, vector<2x10xf32>
    %cst_13 = arith.constant 1.000000e+00 : f32
    %28 = vector.broadcast %cst_13 : f32 to vector<2x10xf32>
    %29 = arith.divf %26, %28 : vector<2x10xf32>
    %cst_14 = arith.constant dense<0xFF800000> : vector<2xf32>
    %30 = vector.multi_reduction <maximumf>, %29, %cst_14 [1] : vector<2x10xf32> to vector<2xf32>
    %31 = vector.shape_cast %30 : vector<2xf32> to vector<2x1xf32>
    %32 = vector.broadcast %31 : vector<2x1xf32> to vector<2x10xf32>
    %33 = arith.subf %29, %32 : vector<2x10xf32>
    %34 = math.exp %33 : vector<2x10xf32>
    %cst_15 = arith.constant dense<0.000000e+00> : vector<2xf32>
    %35 = vector.multi_reduction <add>, %34, %cst_15 [1] : vector<2x10xf32> to vector<2xf32>
    %36 = vector.shape_cast %35 : vector<2xf32> to vector<2x1xf32>
    %37 = math.log %36 : vector<2x1xf32>
    %38 = vector.broadcast %37 : vector<2x1xf32> to vector<2x10xf32>
    %39 = arith.subf %33, %38 : vector<2x10xf32>
    %cst_16 = arith.constant 1.000000e+00 : f32
    %40 = vector.broadcast %cst_16 : f32 to vector<2x10xf32>
    %41 = arith.divf %27, %40 : vector<2x10xf32>
    %cst_17 = arith.constant dense<0xFF800000> : vector<2xf32>
    %42 = vector.multi_reduction <maximumf>, %41, %cst_17 [1] : vector<2x10xf32> to vector<2xf32>
    %43 = vector.shape_cast %42 : vector<2xf32> to vector<2x1xf32>
    %44 = vector.broadcast %43 : vector<2x1xf32> to vector<2x10xf32>
    %45 = arith.subf %41, %44 : vector<2x10xf32>
    %46 = math.exp %45 : vector<2x10xf32>
    %cst_18 = arith.constant dense<0.000000e+00> : vector<2xf32>
    %47 = vector.multi_reduction <add>, %46, %cst_18 [1] : vector<2x10xf32> to vector<2xf32>
    %48 = vector.shape_cast %47 : vector<2xf32> to vector<2x1xf32>
    %49 = math.log %48 : vector<2x1xf32>
    %50 = vector.broadcast %49 : vector<2x1xf32> to vector<2x10xf32>
    %51 = arith.subf %45, %50 : vector<2x10xf32>
    %52 = math.exp %51 : vector<2x10xf32>
    %53 = arith.subf %51, %39 : vector<2x10xf32>
    %54 = arith.mulf %52, %53 : vector<2x10xf32>
    %55 = vector.shape_cast %54 : vector<2x10xf32> to vector<1x2x10xf32>
    %cst_19 = arith.constant dense<0.000000e+00> : vector<1xf32>
    %56 = vector.multi_reduction <add>, %55, %cst_19 [1, 2] : vector<1x2x10xf32> to vector<1xf32>
    %57 = vector.shape_cast %56 : vector<1xf32> to vector<1x1x1xf32>
    %58 = vector.extract %57[0, 0, 0] : f32 from vector<1x1x1xf32>
    %cst_20 = arith.constant 1.000000e+00 : f32
    %59 = arith.mulf %58, %cst_20 : f32
    %cst_21 = arith.constant 2.000000e+01 : f32
    %60 = arith.divf %59, %cst_21 : f32
    %c0_22 = arith.constant 0 : index
    %c1 = arith.constant 1 : index
    %61 = memref.load %arg4[%c0_22, %c1] : memref<1x2xf32, #tpu.memory_space<smem>>
    memref.store %60, %arg4[%c0_22, %c1] : memref<1x2xf32, #tpu.memory_space<smem>>
    return
  }
}

</mosaic_0001>

<bundles_post_ra>
// kernel: tpu_custom_call.1
= control target key start
LH: loop header
LB: loop body
LE: loop exit
PB: predicated region body
PF: predicated region fallthrough
CT: control target
= control target key end

     0   :  { %9 = vsyncpa [#allocation3], 0  ;;  %s278_s0 = inlined_call_operand.vmem [shape: f32[2,10], index: 0, kind: input, shape index: {}]   ;;  %s279_s1 = inlined_call_operand.vmem [shape: s32[2,1], index: 1, kind: input, shape index: {}]   ;;  %s280_s2 = inlined_call_operand.vmem [shape: f32[2,10], index: 2, kind: input, shape index: {}]   ;;  %s281_s3 = inlined_call_operand.hbm [shape: f32[2,10], index: 3, kind: input, shape index: {}]   ;;  %s282_s4 = inlined_call_operand.hbm [shape: f32[1,2], index: 4, kind: output, shape index: {}]  }
   0x1   :  { %10 = vsyncpa [#allocation4], 0  ;;  %s22_s17 = sshll.u32 %s281_s3, 4  ;;  %s224_s18 = smov [#allocation2]   ;;  %s23_s17 = int_to_ptr.hbm [resolvable:$true] %s22_s17 }
   0x2   :  { %s24_s19 = sshll.u32 %s224_s18, 4  ;;  %s25_s19 = int_to_ptr.vmem [resolvable:$true] %s24_s19 }
   0x3   :  { %27 = dma.hbm_to_vmem [thread:$0]  %s23_s17, 32, %s25_s19, [#allocation3]  }
   0x4   :  { %220 = dma.done.wait [#allocation3], 32  }
   0x5   :  { %221 = vsyncadd [#allocation3], 4294967264  ;;  %v225_v0 = vmov 0   ;;  %vm42_vm0 = vcmask 74752   ;;  %v83_v1 = vld [vmem:[#allocation2] sm:$0x3]  ;;  %v33_v21 = vlaneseq }
   0x6   :  { %164 = vset.pattern.permute.xlu1 %v225_v0  ;;  %165 = vset.pattern.permute.xlu0 %v225_v0  ;;  %v32_v2 = vld [vmem:[%s278_s0] sm:$0x3]  ;;  %v96_v3 = vsel %vm42_vm0, %v83_v1, -inf  ;;  %v226_v26 = vmov 0.0   ;;  %vm60_vm2 = vcmask 1024   ;;  %v227_v50 = vmov 2.0  }
   0x7   :  { %v43_v4 = vsel %vm42_vm0, %v32_v2, -inf  ;;  %97 = vmax.xlane.f32.xlu0 %v96_v3  ;;  %v82_v5 = vld [vmem:[%s280_s2] sm:$0x3]  ;;  %v34_v24 = vand.u32 127, %v33_v21  ;;  %v228_v51 = vmov 20.0   ;;  %s138_s27 = sshll.u32 %s282_s4, 4  ;;  %s139_s27 = int_to_ptr.hbm [resolvable:$true] %s138_s27 }
   0x8   :  { %44 = vmax.xlane.f32.xlu1 %v43_v4  ;;  %v84_v6 = vsel %vm42_vm0, %v82_v5, -inf  ;;  %v35_v7 = vld [vmem:[%s279_s1] sm:$0x3]  ;;  %s229_s5 = smov [#allocation5]  }
   0xf   :  { %85 = vmax.xlane.f32.xlu0 %v84_v6 }
  0x21   :  { %37 = vperm.xlu1 %164, %v35_v7  }
  0x7a   :  { %v98_v8 = vpop.xlane.xlu0 %97 }
  0x7b   :  { %v45_v9 = vpop.xlane.xlu1 %44  ;;  %v99_v10 = vsub.f32 %v83_v1, %v98_v8 }
  0x7c   :  { %v46_v11 = vsub.f32 %v32_v2, %v45_v9 }
  0x7d   :  { %v100_v12 = vmul.f32 1.442695, %v99_v10 }
  0x7e   :  { %v47_v13 = vmul.f32 1.442695, %v46_v11 }
  0x7f   :  { %166 = vpow2.f32 %v100_v12 }
  0x80   :  { %168 = vpow2.f32 %v47_v13 }
  0x82   :  { %v86_v14 = vpop.xlane.xlu0 %85 }
  0x83   :  { %v87_v15 = vsub.f32 %v82_v5, %v86_v14 }
  0x85   :  { %v167_v16 = vpop.eup %166  ;;  %v88_v17 = vmul.f32 1.442695, %v87_v15 }
  0x86   :  { %v169_v18 = vpop.eup %168  ;;  %v102_v19 = vsel %vm42_vm0, %v167_v16, 0.0 }
  0x87   :  { %170 = vpow2.f32 %v88_v17  ;;  %103 = vadd.xlane.f32.xlu2 %v102_v19  ;;  %v49_v20 = vsel %vm42_vm0, %v169_v18, 0.0 }
  0x88   :  { %50 = vadd.xlane.f32.xlu0 %v49_v20 }
  0x8d   :  { %v171_v22 = vpop.eup %170 }
  0x8e   :  { %v90_v23 = vsel %vm42_vm0, %v171_v22, 0.0 }
  0x8f   :  { %91 = vadd.xlane.f32.xlu2 %v90_v23 }
  0x93   :  { %v38_v25 = vpop.permute.xlu1 %37 }
  0x94   :  { %vm39_vm1 = vcmp.eq.s32.totalorder %v34_v24, %v38_v25 }
  0x95   :  { %v149_v27 = vsel %vm39_vm1, 1.0, %v226_v26 }
  0x96   :  { %v55_v28 = vmul.f32 %v149_v27, %v32_v2 }
  0x98   :  { %v56_v29 = vsel %vm42_vm0, %v55_v28, 0.0 }
  0x99   :  { %57 = vadd.xlane.f32.xlu2 %v56_v29 }
  0xfa   :  { %v104_v30 = vpop.xlane.xlu2 %103 }
  0xfb   :  { %172 = vlog2.f32 %v104_v30  ;;  %v51_v31 = vpop.xlane.xlu0 %50 }
  0xfc   :  { %174 = vlog2.f32 %v51_v31 }
 0x101   :  { %v173_v32 = vpop.eup %172 }
 0x102   :  { %v106_v33 = vmul.f32 0.6931472, %v173_v32  ;;  %v92_v34 = vpop.xlane.xlu2 %91  ;;  %v175_v35 = vpop.eup %174 }
 0x103   :  { %176 = vlog2.f32 %v92_v34  ;;  %v53_v38 = vmul.f32 0.6931472, %v175_v35 }
 0x104   :  { %v107_v36 = vsub.f32 %v99_v10, %v106_v33 }
 0x105   :  { %v54_v41 = vadd.f32 %v53_v38, %v45_v9 }
 0x106   :  { %v108_v37 = vmul.f32 1.442695, %v107_v36 }
 0x108   :  { %178 = vpow2.f32 %v108_v37 }
 0x109   :  { %v177_v39 = vpop.eup %176  ;;  %180 = vrcp.f32 %v227_v50 }
 0x10a   :  { %v94_v40 = vmul.f32 0.6931472, %v177_v39  ;;  %182 = vrcp.f32 %v228_v51 }
 0x10c   :  { %v58_v42 = vpop.xlane.xlu2 %57  ;;  %v95_v43 = vsub.f32 %v87_v15, %v94_v40 }
 0x10d   :  { %v59_v44 = vsub.f32 %v54_v41, %v58_v42 }
 0x10e   :  { %v179_v45 = vpop.eup %178  ;;  %v110_v47 = vsub.f32 %v107_v36, %v95_v43 }
 0x10f   :  { %v61_v46 = vsel %vm60_vm2, %v59_v44, 0.0  ;;  %v181_v52 = vpop.eup %180 }
 0x110   :  { %62 = vadd.xlane.f32.xlu0 %v61_v46  ;;  %v111_v48 = vmul.f32 %v179_v45, %v110_v47  ;;  %v72_v53 = vmul.f32 2.0, %v181_v52  ;;  %v183_v54 = vpop.eup %182  ;;  %vm76_vm3 = vweird.f32 %v181_v52 }
 0x111   :  { %v123_v56 = vmul.f32 20.0, %v183_v54  ;;  %vm127_vm4 = vweird.f32 %v183_v54 }
 0x112   :  { %v112_v49 = vsel %vm42_vm0, %v111_v48, 0.0  ;;  %v73_v55 = vsub.f32 1.0, %v72_v53 }
 0x113   :  { %113 = vadd.xlane.f32.xlu2 %v112_v49  ;;  %v124_v61 = vsub.f32 1.0, %v123_v56 }
 0x114   :  { %v74_v60 = vmul.f32 %v181_v52, %v73_v55 }
 0x115   :  { %v125_v4 = vmul.f32 %v183_v54, %v124_v61 }
 0x116   :  { %v75_v3 = vadd.f32 %v181_v52, %v74_v60 }
 0x117   :  { %v126_v10 = vadd.f32 %v183_v54, %v125_v4 }
 0x118   :  { %v77_v9 = vsel %vm76_vm3, %v181_v52, %v75_v3 }
 0x119   :  { %v128_v13 = vsel %vm127_vm4, %v183_v54, %v126_v10 }
 0x183   :  { %v63_v57 = vpop.xlane.xlu0 %62 }
 0x184   :  { %v64_v58 = vrot.slane %v63_v57, 4 }
 0x186   :  { %v65_v59 = vadd.f32 %v64_v58, %v63_v57  ;;  %v114_v62 = vpop.xlane.xlu2 %113 }
 0x187   :  { %v115_v0 = vrot.slane %v114_v62, 4 }
 0x188   :  { %v66_v63 = vrot.slane %v65_v59, 2 }
 0x189   :  { %v116_v1 = vadd.f32 %v115_v0, %v114_v62 }
 0x18a   :  { %v67_v2 = vadd.f32 %v66_v63, %v65_v59 }
 0x18b   :  { %v117_v5 = vrot.slane %v116_v1, 2 }
 0x18c   :  { %v68_v6 = vrot.slane %v67_v2, 1 }
 0x18d   :  { %v118_v7 = vadd.f32 %v117_v5, %v116_v1 }
 0x18e   :  { %v69_v8 = vadd.f32 %v68_v6, %v67_v2 }
 0x18f   :  { %v119_v11 = vrot.slane %v118_v7, 1 }
 0x190   :  { %150 = vpush %v69_v8 }
 0x191   :  { %152 = vpush %v77_v9  ;;  %v120_v12 = vadd.f32 %v119_v11, %v118_v7 }
 0x193   :  { %154 = vpush %v120_v12 }
 0x194   :  { %156 = vpush %v128_v13 }
 0x1c1   :  { %s151_s0 = spop %150 }
 0x1c2   :  { %s153_s1 = spop %152 }
 0x1c3   :  { %s79_s2 = smul.f32 %s153_s1, %s151_s0 }
 0x1c4   :  { %s155_s28 = spop %154 }
 0x1c5   :  { %81 = sst [smem:[#allocation5]] %s79_s2  ;;  %s157_s29 = spop %156 }
 0x1c6   :  { %s130_s30 = smul.f32 %s157_s29, %s155_s28 }
 0x1c8   :  { %132 = sst [smem:[#allocation5 + $0x1]] %s130_s30 }
 0x1c9   :  { %141 = dma.smem_to_hbm %s229_s5, 16, %s139_s27, [#allocation4]  }
 0x1ca   :  { %222 = dma.done.wait [#allocation4], 16  }
 0x1cb   :  { %223 = vsyncadd [#allocation4], 4294967280 }
 0x1cc   :  { %146 = sfence }
 0x1cd   :  { %147 = vsyncpa [#allocation3], 1 }
 0x1ce   :  { %148 = vsyncpa [#allocation4], 1 }

</bundles_post_ra>
